<compile_context>
chip_gen: v5e
topology: v5e:2x2
jax: 0.10.0
libtpu: 0.0.40
codegen_flags: <defaults>
</compile_context>

<pallas_src>
import functools

import jax
import jax.numpy as jnp
from jax.experimental import pallas as pl
from jax.experimental.pallas import tpu as pltpu

LANE = 128


def _round_up(x, m):
    return ((x + m - 1) // m) * m


# ----------------------------- Pallas kernel ------------------------------- #
def model_fwd_kernel(x_ref, w1_ref, b1_ref, w2_ref, b2_ref, wp_ref, bp_ref,
                     action_ref, *logit_refs):
    # x arrives f32 from HBM; cast to bf16 at the load (MXU-native input dtype).
    x = x_ref[...].astype(jnp.bfloat16)

    # Encoder layer 1: (TM, OBS) @ (OBS, HID_P), f32 accumulation, ReLU.
    h1 = jnp.dot(x, w1_ref[...], preferred_element_type=jnp.float32) + b1_ref[...]
    h1 = jnp.maximum(h1, 0.0).astype(jnp.bfloat16)

    # Encoder layer 2.
    emb = jnp.dot(h1, w2_ref[...], preferred_element_type=jnp.float32) + b2_ref[...]
    emb = jnp.maximum(emb, 0.0).astype(jnp.bfloat16)

    # PolicyHead: lane-dense (TM, ACT_P=128) logit slab (f32 accumulation).
    # Padded action columns have zero weights and a -1e30 bias so they can
    # never win the argmax.
    logits = jnp.dot(emb, wp_ref[...], preferred_element_type=jnp.float32) + bp_ref[...]

    # Optional logit output, stored bf16 to halve the dominant HBM stream.
    if logit_refs:
        logit_refs[0][...] = logits.astype(jnp.bfloat16)

    # argmax over the last dim (temperature == 0 branch), first-index
    # tie-break to match torch.argmax.  Computed on the transposed logits so
    # the per-row result lands lane-dense as a (1, TM) row (single unmasked
    # contiguous store), instead of a masked (TM, 1) column.
    act_p = logits.shape[-1]
    logits_t = logits.T                                           # (ACT_P, TM), XLU
    row_idx = jax.lax.broadcasted_iota(jnp.int32, logits_t.shape, dimension=0)
    max_t = jnp.max(logits_t, axis=0, keepdims=True)              # (1, TM)
    cand = jnp.where(logits_t == max_t, row_idx, act_p)
    action_ref[...] = jnp.min(cand, axis=0, keepdims=True).astype(jnp.int32)


# --------------------------- parameter staging ------------------------------ #
def stage_params(params):
    """Pad feature dims to the 128-lane width and cast weights to bf16.

    Done once outside the hot path.  Zero-padded hidden columns/rows are exact
    no-ops through ReLU/matmul; padded action columns get a -1e30 bias so they
    never win the argmax.  hid_p/act_p are kept at exactly 128 (no further
    padding) -- the batch (TM) axis is the only useful MXU occupancy knob here.
    """
    w1, b1, w2, b2, wp, bp = params
    obs_dim, hidden = w1.shape
    act_n = wp.shape[1]
    hid_p = _round_up(hidden, LANE)
    act_p = _round_up(act_n, LANE)

    w1p = jnp.zeros((obs_dim, hid_p), jnp.bfloat16).at[:, :hidden].set(
        w1.astype(jnp.bfloat16))
    b1p = jnp.zeros((1, hid_p), jnp.float32).at[:, :hidden].set(b1.reshape(1, -1))
    w2p = jnp.zeros((hid_p, hid_p), jnp.bfloat16).at[:hidden, :hidden].set(
        w2.astype(jnp.bfloat16))
    b2p = jnp.zeros((1, hid_p), jnp.float32).at[:, :hidden].set(b2.reshape(1, -1))
    wpp = jnp.zeros((hid_p, act_p), jnp.bfloat16).at[:hidden, :act_n].set(
        wp.astype(jnp.bfloat16))
    bpp = jnp.full((1, act_p), -1e30, jnp.float32).at[:, :act_n].set(
        bp.reshape(1, -1))
    return (w1p, b1p, w2p, b2p, wpp, bpp), act_n


# ------------------------------ JAX wrapper -------------------------------- #
def model_forward(obs, staged_params, act_n, tm=None, need_logit=True):
    """obs: (T, B, OBS) f32 -> {'action': (T*B,) i32, 'logit': (T*B, A) bf16}."""
    w1, b1, w2, b2, wp, bp = staged_params
    obs_dim = obs.shape[-1]
    hid_p = w1.shape[1]
    act_p = wp.shape[1]

    # flatten_data(obs, 0, 1): reshape only — the dtype cast happens in-kernel
    # so there is no extra f32->bf16 copy of obs in HBM.
    n = obs.shape[0] * obs.shape[1]
    x = obs.reshape(n, obs_dim)

    # Batch tiling: single tile for small n (grid=(1,)), otherwise tm=512
    # (multiple of 256 so the MXU M axis stays full on v6e/v7x).
    if tm is None:
        tm = 512
    tm = _round_up(min(tm, _round_up(n, 256)), 256)
    n_pad = _round_up(n, tm)
    if n_pad != n:
        x = jnp.pad(x, ((0, n_pad - n), (0, 0)))
    n_tiles = n_pad // tm
    grid = (n_tiles,)

    # Megacore sharding only when there are enough sizable tiles (v7x); a
    # single tiny tile per core would just duplicate weight staging.
    dims = ("parallel",) if (n_tiles >= 4 and tm >= 512) else ("arbitrary",)

    flops = 2 * n_pad * (obs_dim * hid_p + hid_p * hid_p + hid_p * act_p)
    bytes_accessed = (n_pad * obs_dim * 4                       # x read (f32)
                      + w1.nbytes + w2.nbytes + wp.nbytes       # bf16 weights
                      + b1.nbytes + b2.nbytes + bp.nbytes       # f32 biases
                      + n_pad * 4)                              # action (i32)
    if need_logit:
        bytes_accessed += n_pad * act_p * 2                     # bf16 logits

    out_shape = [jax.ShapeDtypeStruct((n_tiles, tm), jnp.int32)]     # action rows
    out_specs = [pl.BlockSpec((1, tm), lambda i: (i, 0))]            # lane-dense
    if need_logit:
        out_shape.append(jax.ShapeDtypeStruct((n_pad, act_p), jnp.bfloat16))
        out_specs.append(pl.BlockSpec((tm, act_p), lambda i: (i, 0)))

    outs = pl.pallas_call(
        model_fwd_kernel,
        grid=grid,
        in_specs=[
            pl.BlockSpec((tm, obs_dim), lambda i: (i, 0)),      # x tile
            pl.BlockSpec((obs_dim, hid_p), lambda i: (0, 0)),   # w1 (resident)
            pl.BlockSpec((1, hid_p), lambda i: (0, 0)),         # b1 (resident)
            pl.BlockSpec((hid_p, hid_p), lambda i: (0, 0)),     # w2 (resident)
            pl.BlockSpec((1, hid_p), lambda i: (0, 0)),         # b2 (resident)
            pl.BlockSpec((hid_p, act_p), lambda i: (0, 0)),     # wp (resident)
            pl.BlockSpec((1, act_p), lambda i: (0, 0)),         # bp (resident)
        ],
        out_specs=out_specs,
        out_shape=out_shape,
        compiler_params=pltpu.CompilerParams(
            dimension_semantics=dims,
            vmem_limit_bytes=32 * 1024 * 1024),                 # safe on v5e/v6e/v7x
        cost_estimate=pl.CostEstimate(
            flops=flops, transcendentals=0, bytes_accessed=bytes_accessed),
    )(x, w1, b1, w2, b2, wp, bp)

    action = outs[0].reshape(-1)[:n]           # contiguous flatten + row slice
    result = {"action": action}
    if need_logit:
        # Row slice is free when n == n_pad; the lane slice to act_n columns
        # now runs over a bf16 (half-width) buffer.  Callers that can consume
        # the padded 128-lane slab should index lazily instead.
        result["logit"] = outs[1][:n, :act_n]
    return result


# --------------------------- param initialization --------------------------- #
def init_params(key, obs_dim, hidden, action_num):
    k1, k2, k3 = jax.random.split(key, 3)
    w1 = jax.random.normal(k1, (obs_dim, hidden), jnp.float32) * 0.1
    b1 = jnp.zeros((1, hidden), jnp.float32)
    w2 = jax.random.normal(k2, (hidden, hidden), jnp.float32) * 0.1
    b2 = jnp.zeros((1, hidden), jnp.float32)
    wp = jax.random.normal(k3, (hidden, action_num), jnp.float32) * 0.1
    bp = jnp.zeros((1, action_num), jnp.float32)
    return (w1, b1, w2, b2, wp, bp)


if __name__ == "__main__":
    T, B = 4, 64                 # (timestep, envs) leading dims that get flattened
    OBS_DIM = 32
    HIDDEN = 64
    ACTION_NUM = 16

    key = jax.random.PRNGKey(0)
    k_obs, k_par = jax.random.split(key)
    obs = jax.random.normal(k_obs, (T, B, OBS_DIM), jnp.float32)
    params = init_params(k_par, OBS_DIM, HIDDEN, ACTION_NUM)

    staged, act_n = stage_params(params)
    fwd = jax.jit(functools.partial(model_forward, act_n=act_n))
    out = fwd(obs, staged)
    jax.block_until_ready(out)

    # Pure-JAX reference mirroring the in-kernel bf16 weight/input quantization
    # (f32 accumulation, f32 biases).
    w1, b1, w2, b2, wp, bp = params
    f = lambda a: a.astype(jnp.bfloat16).astype(jnp.float32)
    xr = obs.reshape(T * B, OBS_DIM)
    h = jnp.maximum(f(xr) @ f(w1) + b1, 0.0)
    e = jnp.maximum(f(h) @ f(w2) + b2, 0.0)
    ref_logit = f(e) @ f(wp) + bp

    assert out["logit"].shape == (T * B, ACTION_NUM)
    assert out["action"].shape == (T * B,)
    # Kernel stores logits in bf16 -> compare with bf16-level tolerance.
    assert jnp.allclose(out["logit"].astype(jnp.float32), ref_logit,
                        atol=2e-2, rtol=2e-2)
    # Kernel argmax runs on f32 pre-rounding logits, which match the f32 ref.
    assert jnp.all(out["action"] == jnp.argmax(ref_logit, axis=-1))

    print("KERNEL_OK")
</pallas_src>

<mosaic_0001>
module attributes {stable_mosaic.version = 11 : i64} {
  func.func @model_fwd_kernel(%arg0: i32, %arg1: memref<256x32xf32, #tpu.memory_space<vmem>>, %arg2: memref<32x128xbf16, #tpu.memory_space<vmem>>, %arg3: memref<1x128xf32, #tpu.memory_space<vmem>>, %arg4: memref<128x128xbf16, #tpu.memory_space<vmem>>, %arg5: memref<1x128xf32, #tpu.memory_space<vmem>>, %arg6: memref<128x128xbf16, #tpu.memory_space<vmem>>, %arg7: memref<1x128xf32, #tpu.memory_space<vmem>>, %arg8: memref<1x256xi32, #tpu.memory_space<vmem>>, %arg9: memref<256x128xbf16, #tpu.memory_space<vmem>>) attributes {dimension_semantics = [#tpu.dimension_semantics<arbitrary>], iteration_bounds = array<i64: 1>, scalar_prefetch = 0 : i64, scratch_operands = 0 : i64, tpu.core_type = #tpu.core_type<tc>, window_params = [{transform_indices = @transform_0, window_bounds = array<i64: 256, 32>}, {pipeline_mode = #tpu.pipeline_mode<synchronous>, transform_indices = @transform_1, window_bounds = array<i64: 32, 128>}, {pipeline_mode = #tpu.pipeline_mode<synchronous>, transform_indices = @transform_2, window_bounds = array<i64: 1, 128>}, {pipeline_mode = #tpu.pipeline_mode<synchronous>, transform_indices = @transform_3, window_bounds = array<i64: 128, 128>}, {pipeline_mode = #tpu.pipeline_mode<synchronous>, transform_indices = @transform_4, window_bounds = array<i64: 1, 128>}, {pipeline_mode = #tpu.pipeline_mode<synchronous>, transform_indices = @transform_5, window_bounds = array<i64: 128, 128>}, {pipeline_mode = #tpu.pipeline_mode<synchronous>, transform_indices = @transform_6, window_bounds = array<i64: 1, 128>}, {transform_indices = @transform_7, window_bounds = array<i64: 1, 256>}, {transform_indices = @transform_8, window_bounds = array<i64: 256, 128>}]} {
    %c0 = arith.constant 0 : index
    %c0_0 = arith.constant 0 : index
    %0 = vector.load %arg1[%c0, %c0_0] : memref<256x32xf32, #tpu.memory_space<vmem>>, vector<256x32xf32>
    %1 = arith.truncf %0 : vector<256x32xf32> to vector<256x32xbf16>
    %c0_1 = arith.constant 0 : index
    %c0_2 = arith.constant 0 : index
    %2 = vector.load %arg2[%c0_1, %c0_2] : memref<32x128xbf16, #tpu.memory_space<vmem>>, vector<32x128xbf16>
    %cst = arith.constant dense<0.000000e+00> : vector<256x128xf32>
    %3 = tpu.matmul %1, %2, %cst {dimension_numbers = #tpu.dot_dimension_numbers<[1], [0], [0], [1], [0, 0, 1, 1], [], []>} : vector<256x32xbf16>, vector<32x128xbf16>, vector<256x128xf32> -> vector<256x128xf32>
    %c0_3 = arith.constant 0 : index
    %c0_4 = arith.constant 0 : index
    %4 = vector.load %arg3[%c0_3, %c0_4] : memref<1x128xf32, #tpu.memory_space<vmem>>, vector<1x128xf32>
    %5 = vector.broadcast %4 : vector<1x128xf32> to vector<256x128xf32>
    %6 = arith.addf %3, %5 : vector<256x128xf32>
    %cst_5 = arith.constant 0.000000e+00 : f32
    %7 = vector.broadcast %cst_5 : f32 to vector<256x128xf32>
    %8 = arith.maximumf %6, %7 : vector<256x128xf32>
    %9 = arith.truncf %8 : vector<256x128xf32> to vector<256x128xbf16>
    %c0_6 = arith.constant 0 : index
    %c0_7 = arith.constant 0 : index
    %10 = vector.load %arg4[%c0_6, %c0_7] : memref<128x128xbf16, #tpu.memory_space<vmem>>, vector<128x128xbf16>
    %cst_8 = arith.constant dense<0.000000e+00> : vector<256x128xf32>
    %11 = tpu.matmul %9, %10, %cst_8 {dimension_numbers = #tpu.dot_dimension_numbers<[1], [0], [0], [1], [0, 0, 1, 1], [], []>} : vector<256x128xbf16>, vector<128x128xbf16>, vector<256x128xf32> -> vector<256x128xf32>
    %c0_9 = arith.constant 0 : index
    %c0_10 = arith.constant 0 : index
    %12 = vector.load %arg5[%c0_9, %c0_10] : memref<1x128xf32, #tpu.memory_space<vmem>>, vector<1x128xf32>
    %13 = vector.broadcast %12 : vector<1x128xf32> to vector<256x128xf32>
    %14 = arith.addf %11, %13 : vector<256x128xf32>
    %cst_11 = arith.constant 0.000000e+00 : f32
    %15 = vector.broadcast %cst_11 : f32 to vector<256x128xf32>
    %16 = arith.maximumf %14, %15 : vector<256x128xf32>
    %17 = arith.truncf %16 : vector<256x128xf32> to vector<256x128xbf16>
    %c0_12 = arith.constant 0 : index
    %c0_13 = arith.constant 0 : index
    %18 = vector.load %arg6[%c0_12, %c0_13] : memref<128x128xbf16, #tpu.memory_space<vmem>>, vector<128x128xbf16>
    %cst_14 = arith.constant dense<0.000000e+00> : vector<256x128xf32>
    %19 = tpu.matmul %17, %18, %cst_14 {dimension_numbers = #tpu.dot_dimension_numbers<[1], [0], [0], [1], [0, 0, 1, 1], [], []>} : vector<256x128xbf16>, vector<128x128xbf16>, vector<256x128xf32> -> vector<256x128xf32>
    %c0_15 = arith.constant 0 : index
    %c0_16 = arith.constant 0 : index
    %20 = vector.load %arg7[%c0_15, %c0_16] : memref<1x128xf32, #tpu.memory_space<vmem>>, vector<1x128xf32>
    %21 = vector.broadcast %20 : vector<1x128xf32> to vector<256x128xf32>
    %22 = arith.addf %19, %21 : vector<256x128xf32>
    %23 = arith.truncf %22 : vector<256x128xf32> to vector<256x128xbf16>
    %c0_17 = arith.constant 0 : index
    %c0_18 = arith.constant 0 : index
    %24 = vector.load %arg9[%c0_17, %c0_18] : memref<256x128xbf16, #tpu.memory_space<vmem>>, vector<256x128xbf16>
    tpu.vector_store %arg9[%c0_17, %c0_18], %23 {strides = array<i32>} : memref<256x128xbf16, #tpu.memory_space<vmem>>, vector<256x128xbf16>,
    %25 = tpu.transpose %22, [1, 0] : vector<256x128xf32> -> vector<128x256xf32>
    %26 = tpu.iota {dimensions = array<i32: 0>} : vector<128x256xi32>
    %cst_19 = arith.constant dense<0xFF800000> : vector<256xf32>
    %27 = vector.multi_reduction <maximumf>, %25, %cst_19 [0] : vector<128x256xf32> to vector<256xf32>
    %28 = vector.shape_cast %27 : vector<256xf32> to vector<1x256xf32>
    %29 = vector.broadcast %28 : vector<1x256xf32> to vector<128x256xf32>
    %30 = arith.cmpf oeq, %25, %29 : vector<128x256xf32>
    %c128_i32 = arith.constant 128 : i32
    %31 = vector.broadcast %c128_i32 : i32 to vector<128x256xi32>
    %32 = arith.select %30, %26, %31 : vector<128x256xi1>, vector<128x256xi32>
    %cst_20 = arith.constant dense<2147483647> : vector<256xi32>
    %33 = vector.multi_reduction <minsi>, %32, %cst_20 [0] : vector<128x256xi32> to vector<256xi32>
    %34 = vector.shape_cast %33 : vector<256xi32> to vector<1x256xi32>
    %c0_21 = arith.constant 0 : index
    %c0_22 = arith.constant 0 : index
    %35 = vector.load %arg8[%c0_21, %c0_22] : memref<1x256xi32, #tpu.memory_space<vmem>>, vector<1x256xi32>
    tpu.vector_store %arg8[%c0_21, %c0_22], %34 {strides = array<i32>} : memref<1x256xi32, #tpu.memory_space<vmem>>, vector<1x256xi32>,
    return
  }
  func.func @transform_0(%arg0: i32) -> (i32, i32) {
    %c0_i32 = arith.constant 0 : i32
    %c0_i32_0 = arith.constant 0 : i32
    return %arg0, %c0_i32 : i32, i32
  }
  func.func @transform_1(%arg0: i32) -> (i32, i32) {
    %c0_i32 = arith.constant 0 : i32
    %c0_i32_0 = arith.constant 0 : i32
    %c0_i32_1 = arith.constant 0 : i32
    return %c0_i32, %c0_i32_0 : i32, i32
  }
  func.func @transform_2(%arg0: i32) -> (i32, i32) {
    %c0_i32 = arith.constant 0 : i32
    %c0_i32_0 = arith.constant 0 : i32
    %c0_i32_1 = arith.constant 0 : i32
    return %c0_i32, %c0_i32_0 : i32, i32
  }
  func.func @transform_3(%arg0: i32) -> (i32, i32) {
    %c0_i32 = arith.constant 0 : i32
    %c0_i32_0 = arith.constant 0 : i32
    %c0_i32_1 = arith.constant 0 : i32
    return %c0_i32, %c0_i32_0 : i32, i32
  }
  func.func @transform_4(%arg0: i32) -> (i32, i32) {
    %c0_i32 = arith.constant 0 : i32
    %c0_i32_0 = arith.constant 0 : i32
    %c0_i32_1 = arith.constant 0 : i32
    return %c0_i32, %c0_i32_0 : i32, i32
  }
  func.func @transform_5(%arg0: i32) -> (i32, i32) {
    %c0_i32 = arith.constant 0 : i32
    %c0_i32_0 = arith.constant 0 : i32
    %c0_i32_1 = arith.constant 0 : i32
    return %c0_i32, %c0_i32_0 : i32, i32
  }
  func.func @transform_6(%arg0: i32) -> (i32, i32) {
    %c0_i32 = arith.constant 0 : i32
    %c0_i32_0 = arith.constant 0 : i32
    %c0_i32_1 = arith.constant 0 : i32
    return %c0_i32, %c0_i32_0 : i32, i32
  }
  func.func @transform_7(%arg0: i32) -> (i32, i32) {
    %c0_i32 = arith.constant 0 : i32
    %c0_i32_0 = arith.constant 0 : i32
    return %arg0, %c0_i32 : i32, i32
  }
  func.func @transform_8(%arg0: i32) -> (i32, i32) {
    %c0_i32 = arith.constant 0 : i32
    %c0_i32_0 = arith.constant 0 : i32
    return %arg0, %c0_i32 : i32, i32
  }
}

</mosaic_0001>

<bundles_post_ra>
// kernel: model_forward.1
= control target key start
LH: loop header
LB: loop body
LE: loop exit
PB: predicated region body
PF: predicated region fallthrough
CT: control target
= control target key end

     0   :  { %s1833_s0 = inlined_call_operand.vmem [shape: f32[256,32], index: 0, kind: input, shape index: {}]   ;;  %s1834_s1 = inlined_call_operand.vmem [shape: bf16[32,128], index: 1, kind: input, shape index: {}]   ;;  %s1835_s2 = inlined_call_operand.vmem [shape: f32[1,128], index: 2, kind: input, shape index: {}]   ;;  %s1836_s3 = inlined_call_operand.vmem [shape: bf16[128,128], index: 3, kind: input, shape index: {}]   ;;  %s1837_s4 = inlined_call_operand.vmem [shape: f32[1,128], index: 4, kind: input, shape index: {}]   ;;  %s1838_s5 = inlined_call_operand.vmem [shape: bf16[128,128], index: 5, kind: input, shape index: {}]   ;;  %s1839_s6 = inlined_call_operand.vmem [shape: f32[1,128], index: 6, kind: input, shape index: {}]   ;;  %s1840_s7 = inlined_call_operand.hbm [shape: s32[1,256], index: 7, kind: output, shape index: {0}]   ;;  %s1841_s8 = inlined_call_operand.vmem [shape: bf16[256,128], index: 8, kind: output, shape index: {1}]  }
   0x1   :  { %v1092_v0 = vld [vmem:[%s1834_s1 + $0x8] sm:$0xff]  ;;  %v1091_v1 = vld [vmem:[%s1834_s1] sm:$0xff] }
   0x2   :  { %153 = vmatpush.bf16.msra.mxu0 %v1092_v0  ;;  %v30_v2 = vld [vmem:[%s1833_s0] sm:$0xff]  ;;  %v31_v3 = vld [vmem:[%s1833_s0 + $0x8] sm:$0xff]  ;;  %1204 = vmatpush.bf16.msra.mxu3 %v1092_v0 }
   0x3   :  { %14 = vsyncpa [#allocation3], 0  ;;  %v62_v4 = vpack.c.bf16 %v31_v3, %v30_v2  ;;  %vm98_vm0 = vcmask 261120   ;;  %v32_v5 = vld [vmem:[%s1833_s0 + $0x10] sm:$0xff]  ;;  %v33_v6 = vld [vmem:[%s1833_s0 + $0x18] sm:$0xff]  ;;  %s990_s15 = sshll.u32 %s1840_s7, 4  ;;  %s991_s15 = int_to_ptr.hbm [resolvable:$true] %s990_s15 }
   0x4   :  { %v63_v7 = vpack.c.bf16 %v33_v6, %v32_v5  ;;  %v34_v8 = vld [vmem:[%s1833_s0 + $0x20] sm:$0xff]  ;;  %v35_v9 = vld [vmem:[%s1833_s0 + $0x28] sm:$0xff]  ;;  %v36_v11 = vld [vmem:[%s1833_s0 + $0x30] sm:$0xff] }
   0x5   :  { %v64_v10 = vpack.c.bf16 %v35_v9, %v34_v8  ;;  %v37_v12 = vld [vmem:[%s1833_s0 + $0x38] sm:$0xff]  ;;  %v38_v14 = vld [vmem:[%s1833_s0 + $0x40] sm:$0xff]  ;;  %v39_v15 = vld [vmem:[%s1833_s0 + $0x48] sm:$0xff] }
   0x6   :  { %154 = vmatpush.bf16.msra.mxu0 %v1091_v1  ;;  %1205 = vmatpush.bf16.msra.mxu3 %v1091_v1  ;;  %v65_v13 = vpack.c.bf16 %v37_v12, %v36_v11  ;;  %v66_v16 = vpack.c.bf16 %v39_v15, %v38_v14  ;;  %v1100_v17 = vld [vmem:[%s1836_s3 + $0x38] sm:$0xff]  ;;  %v40_v18 = vld [vmem:[%s1833_s0 + $0x50] sm:$0xff]  ;;  %v1098_v22 = vld [vmem:[%s1836_s3 + $0x28] sm:$0xff] }
   0x7   :  { %352 = vmatpush.bf16.msra.mxu1 %v1100_v17  ;;  %v41_v19 = vld [vmem:[%s1833_s0 + $0x58] sm:$0xff]  ;;  %v1099_v21 = vld [vmem:[%s1836_s3 + $0x30] sm:$0xff]  ;;  %v1097_v23 = vld [vmem:[%s1836_s3 + $0x20] sm:$0xff] }
   0x8   :  { %v67_v20 = vpack.c.bf16 %v41_v19, %v40_v18  ;;  %v42_v24 = vld [vmem:[%s1833_s0 + $0x60] sm:$0xff]  ;;  %v43_v25 = vld [vmem:[%s1833_s0 + $0x68] sm:$0xff]  ;;  %v1096_v26 = vld [vmem:[%s1836_s3 + $0x18] sm:$0xff] }
   0x9   :  { %1011 = vmatmul.msk.bf16.vlgmr.msra.gmra.mxu0 %vm98_vm0, %v62_v4  ;;  %v68_v27 = vpack.c.bf16 %v43_v25, %v42_v24  ;;  %v1095_v28 = vld [vmem:[%s1836_s3 + $0x10] sm:$0xff]  ;;  %v1094_v29 = vld [vmem:[%s1836_s3 + $0x8] sm:$0xff]  ;;  %v1093_v30 = vld [vmem:[%s1836_s3] sm:$0xff] }
   0xa   :  { %1206 = vmatpush.bf16.msrb.mxu3 %v1100_v17  ;;  %v44_v31 = vld [vmem:[%s1833_s0 + $0x70] sm:$0xff]  ;;  %v45_v32 = vld [vmem:[%s1833_s0 + $0x78] sm:$0xff]  ;;  %v46_v34 = vld [vmem:[%s1833_s0 + $0x80] sm:$0xff] }
   0xb   :  { %353 = vmatpush.bf16.msra.mxu1 %v1099_v21  ;;  %v69_v33 = vpack.c.bf16 %v45_v32, %v44_v31  ;;  %v47_v35 = vld [vmem:[%s1833_s0 + $0x88] sm:$0xff]  ;;  %v1393_v38 = vld [vmem:[%s1835_s2] ss:$0 sm:$0xff]  ;;  %v48_v44 = vld [vmem:[%s1833_s0 + $0x90] sm:$0xff] }
   0xc   :  { %v70_v36 = vpack.c.bf16 %v47_v35, %v46_v34  ;;  %v49_v45 = vld [vmem:[%s1833_s0 + $0x98] sm:$0xff]  ;;  %v50_v54 = vld [vmem:[%s1833_s0 + $0xa0] sm:$0xff]  ;;  %v51_v55 = vld [vmem:[%s1833_s0 + $0xa8] sm:$0xff] }
   0xd   :  { %v71_v47 = vpack.c.bf16 %v49_v45, %v48_v44  ;;  %v72_v57 = vpack.c.bf16 %v51_v55, %v50_v54  ;;  %v56_v59 = vld [vmem:[%s1833_s0 + $0xd0] sm:$0xff]  ;;  %v57_v60 = vld [vmem:[%s1833_s0 + $0xd8] sm:$0xff]  ;;  %v58_v8 = vld [vmem:[%s1833_s0 + $0xe0] sm:$0xff] }
   0xe   :  { %1207 = vmatpush.bf16.msrb.mxu3 %v1099_v21  ;;  %v75_v61 = vpack.c.bf16 %v57_v60, %v56_v59  ;;  %v52_v3 = vld [vmem:[%s1833_s0 + $0xb0] sm:$0xff]  ;;  %v53_v4 = vld [vmem:[%s1833_s0 + $0xb8] sm:$0xff]  ;;  %v59_v9 = vld [vmem:[%s1833_s0 + $0xe8] sm:$0xff] }
   0xf   :  { %354 = vmatpush.bf16.msra.mxu1 %v1098_v22  ;;  %v73_v6 = vpack.c.bf16 %v53_v4, %v52_v3  ;;  %v55_v17 = vld [vmem:[%s1833_s0 + $0xc8] sm:$0xff]  ;;  %v60_v21 = vld [vmem:[%s1833_s0 + $0xf0] sm:$0xff]  ;;  %v1108_v34 = vld [vmem:[%s1838_s5 + $0x38] sm:$0xff] }
  0x10   :  { %1024 = vmatmul.msk.bf16.vlgmr.msra.gmra.mxu3 %vm98_vm0, %v75_v61  ;;  %557 = vmatpush.bf16.msra.mxu2 %v1108_v34  ;;  %v1490_v4 = vld [vmem:[%s1837_s4] ss:$0 sm:$0xff] }
  0x12   :  { %1208 = vmatpush.bf16.msrb.mxu3 %v1098_v22  ;;  %v61_v22 = vld [vmem:[%s1833_s0 + $0xf8] sm:$0xff] }
  0x13   :  { %355 = vmatpush.bf16.msra.mxu1 %v1097_v23 }
  0x16   :  { %1209 = vmatpush.bf16.msrb.mxu3 %v1097_v23  ;;  %v77_v23 = vpack.c.bf16 %v61_v22, %v60_v21 }
  0x17   :  { %356 = vmatpush.bf16.msra.mxu1 %v1096_v26 }
  0x19   :  { %1012 = vmatmul.msk.bf16.gmra.mxu0 %vm98_vm0, %v63_v7 }
  0x1a   :  { %1210 = vmatpush.bf16.msrb.mxu3 %v1096_v26 }
  0x1b   :  { %357 = vmatpush.bf16.msra.mxu1 %v1095_v28 }
  0x1e   :  { %1211 = vmatpush.bf16.msrb.mxu3 %v1095_v28 }
  0x1f   :  { %358 = vmatpush.bf16.msra.mxu1 %v1094_v29 }
  0x22   :  { %1212 = vmatpush.bf16.msrb.mxu3 %v1094_v29 }
  0x23   :  { %359 = vmatpush.bf16.msra.mxu1 %v1093_v30 }
  0x26   :  { %1213 = vmatpush.bf16.msrb.mxu3 %v1093_v30 }
  0x29   :  { %1013 = vmatmul.msk.bf16.gmra.mxu0 %vm98_vm0, %v64_v10  ;;  %v76_v10 = vpack.c.bf16 %v59_v9, %v58_v8 }
  0x2a   :  { %1214 = vmatpush.bf16.msra.mxu3 %v1108_v34 }
  0x2b   :  { %1025 = vmatmul.msk.bf16.gmra.mxu3 %vm98_vm0, %v76_v10 }
  0x39   :  { %1014 = vmatmul.msk.bf16.gmra.mxu0 %vm98_vm0, %v65_v13 }
  0x3b   :  { %1026 = vmatmul.msk.bf16.gmra.mxu3 %vm98_vm0, %v77_v23 }
  0x49   :  { %1015 = vmatmul.msk.bf16.gmra.mxu0 %vm98_vm0, %v66_v16  ;;  %v54_v16 = vld [vmem:[%s1833_s0 + $0xc0] sm:$0xff] }
  0x4a   :  { %v74_v19 = vpack.c.bf16 %v55_v17, %v54_v16 }
  0x59   :  { %1016 = vmatmul.msk.bf16.gmra.mxu0 %vm98_vm0, %v67_v20 }
  0x69   :  { %1017 = vmatmul.msk.bf16.gmra.mxu0 %vm98_vm0, %v68_v27 }
  0x79   :  { %1018 = vmatmul.msk.bf16.gmra.mxu0 %vm98_vm0, %v69_v33 }
  0x86   :  { %v156_v37 = vpop.f32.mrf.mxu0 }
  0x87   :  { %v157_v39 = vadd.f32 %v1393_v38, %v156_v37 }
  0x89   :  { %1019 = vmatmul.msk.bf16.gmra.mxu0 %vm98_vm0, %v70_v36  ;;  %v236_v42 = vmax.f32 %v157_v39, 0.0  ;;  %v1107_v39 = vld [vmem:[%s1838_s5 + $0x30] sm:$0xff] }
  0x8a   :  { %558 = vmatpush.bf16.msra.mxu2 %v1107_v39  ;;  %1215 = vmatpush.bf16.msra.mxu3 %v1107_v39 }
  0x8e   :  { %v158_v40 = vpop.f32.mrf.mxu0 }
  0x8f   :  { %v159_v41 = vadd.f32 %v1393_v38, %v158_v40 }
  0x91   :  { %v237_v43 = vmax.f32 %v159_v41, 0.0  ;;  %v1106_v41 = vld [vmem:[%s1838_s5 + $0x28] sm:$0xff] }
  0x92   :  { %559 = vmatpush.bf16.msra.mxu2 %v1106_v41  ;;  %1216 = vmatpush.bf16.msra.mxu3 %v1106_v41 }
  0x93   :  { %v268_v46 = vpack.c.bf16 %v237_v43, %v236_v42  ;;  %v1105_v42 = vld [vmem:[%s1838_s5 + $0x20] sm:$0xff] }
  0x95   :  { %360 = vmatmul.bf16.vlgmr.msra.gmra.mxu1 %v268_v46  ;;  %v1104_v46 = vld [vmem:[%s1838_s5 + $0x18] sm:$0xff] }
  0x96   :  { %v161_v48 = vpop.f32.mrf.mxu0  ;;  %560 = vmatpush.bf16.msra.mxu2 %v1105_v42  ;;  %1217 = vmatpush.bf16.msra.mxu3 %v1105_v42 }
  0x97   :  { %v162_v49 = vadd.f32 %v1393_v38, %v161_v48 }
  0x99   :  { %1020 = vmatmul.msk.bf16.gmra.mxu0 %vm98_vm0, %v71_v47  ;;  %v238_v52 = vmax.f32 %v162_v49, 0.0 }
  0x9a   :  { %561 = vmatpush.bf16.msra.mxu2 %v1104_v46  ;;  %1218 = vmatpush.bf16.msra.mxu3 %v1104_v46 }
  0x9e   :  { %v163_v50 = vpop.f32.mrf.mxu0 }
  0x9f   :  { %v164_v51 = vadd.f32 %v1393_v38, %v163_v50  ;;  %v1103_v50 = vld [vmem:[%s1838_s5 + $0x10] sm:$0xff] }
  0xa0   :  { %562 = vmatpush.bf16.msra.mxu2 %v1103_v50  ;;  %1219 = vmatpush.bf16.msra.mxu3 %v1103_v50 }
  0xa1   :  { %v239_v53 = vmax.f32 %v164_v51, 0.0 }
  0xa3   :  { %v269_v56 = vpack.c.bf16 %v239_v53, %v238_v52  ;;  %v1102_v52 = vld [vmem:[%s1838_s5 + $0x8] sm:$0xff]  ;;  %v1101_v53 = vld [vmem:[%s1838_s5] sm:$0xff] }
  0xa4   :  { %563 = vmatpush.bf16.msra.mxu2 %v1102_v52  ;;  %1220 = vmatpush.bf16.msra.mxu3 %v1102_v52 }
  0xa5   :  { %365 = vmatmul.bf16.gmra.mxu1 %v269_v56 }
  0xa6   :  { %v166_v58 = vpop.f32.mrf.mxu0 }
  0xa7   :  { %v167_v62 = vadd.f32 %v1393_v38, %v166_v58 }
  0xa8   :  { %564 = vmatpush.bf16.msra.mxu2 %v1101_v53  ;;  %1221 = vmatpush.bf16.msra.mxu3 %v1101_v53 }
  0xa9   :  { %1021 = vmatmul.msk.bf16.gmra.mxu0 %vm98_vm0, %v72_v57  ;;  %v240_v1 = vmax.f32 %v167_v62, 0.0 }
  0xae   :  { %v168_v63 = vpop.f32.mrf.mxu0 }
  0xaf   :  { %v169_v0 = vadd.f32 %v1393_v38, %v168_v63 }
  0xb1   :  { %v241_v2 = vmax.f32 %v169_v0, 0.0 }
  0xb3   :  { %v270_v5 = vpack.c.bf16 %v241_v2, %v240_v1 }
  0xb5   :  { %370 = vmatmul.bf16.gmra.mxu1 %v270_v5 }
  0xb6   :  { %v171_v7 = vpop.f32.mrf.mxu0 }
  0xb7   :  { %v172_v11 = vadd.f32 %v1393_v38, %v171_v7 }
  0xb9   :  { %1022 = vmatmul.msk.bf16.gmra.mxu0 %vm98_vm0, %v73_v6  ;;  %v242_v14 = vmax.f32 %v172_v11, 0.0 }
  0xbe   :  { %v173_v12 = vpop.f32.mrf.mxu0 }
  0xbf   :  { %v174_v13 = vadd.f32 %v1393_v38, %v173_v12 }
  0xc1   :  { %v243_v15 = vmax.f32 %v174_v13, 0.0 }
  0xc3   :  { %v271_v18 = vpack.c.bf16 %v243_v15, %v242_v14 }
  0xc5   :  { %375 = vmatmul.bf16.gmra.mxu1 %v271_v18 }
  0xc6   :  { %v176_v20 = vpop.f32.mrf.mxu0 }
  0xc7   :  { %v177_v24 = vadd.f32 %v1393_v38, %v176_v20 }
  0xc9   :  { %1023 = vmatmul.msk.bf16.gmra.mxu0 %vm98_vm0, %v74_v19  ;;  %v244_v27 = vmax.f32 %v177_v24, 0.0 }
  0xce   :  { %v178_v25 = vpop.f32.mrf.mxu0 }
  0xcf   :  { %v179_v26 = vadd.f32 %v1393_v38, %v178_v25 }
  0xd1   :  { %v245_v28 = vmax.f32 %v179_v26, 0.0 }
  0xd3   :  { %v272_v29 = vpack.c.bf16 %v245_v28, %v244_v27 }
  0xd5   :  { %380 = vmatmul.bf16.gmra.mxu1 %v272_v29 }
  0xd6   :  { %v181_v30 = vpop.f32.mrf.mxu0 }
  0xd7   :  { %v182_v31 = vadd.f32 %v1393_v38, %v181_v30 }
  0xd9   :  { %v246_v35 = vmax.f32 %v182_v31, 0.0 }
  0xde   :  { %v183_v32 = vpop.f32.mrf.mxu0 }
  0xdf   :  { %v184_v33 = vadd.f32 %v1393_v38, %v183_v32 }
  0xe1   :  { %v247_v36 = vmax.f32 %v184_v33, 0.0 }
  0xe3   :  { %v273_v37 = vpack.c.bf16 %v247_v36, %v246_v35 }
  0xe5   :  { %385 = vmatmul.bf16.gmra.mxu1 %v273_v37 }
  0xe6   :  { %v186_v40 = vpop.f32.mrf.mxu0 }
  0xe7   :  { %v187_v43 = vadd.f32 %v1393_v38, %v186_v40 }
  0xe9   :  { %v248_v47 = vmax.f32 %v187_v43, 0.0 }
  0xee   :  { %v188_v44 = vpop.f32.mrf.mxu0 }
  0xef   :  { %v189_v45 = vadd.f32 %v1393_v38, %v188_v44 }
  0xf1   :  { %v249_v48 = vmax.f32 %v189_v45, 0.0 }
  0xf3   :  { %v274_v49 = vpack.c.bf16 %v249_v48, %v248_v47 }
  0xf5   :  { %390 = vmatmul.bf16.gmra.mxu1 %v274_v49  ;;  %v221_v49 = vpop.f32.mrf.mxu3 }
  0xf6   :  { %v191_v51 = vpop.f32.mrf.mxu0 }
  0xf7   :  { %v192_v54 = vadd.f32 %v1393_v38, %v191_v51 }
  0xf9   :  { %v250_v57 = vmax.f32 %v192_v54, 0.0 }
  0xfe   :  { %v193_v55 = vpop.f32.mrf.mxu0 }
  0xff   :  { %v194_v56 = vadd.f32 %v1393_v38, %v193_v55 }
 0x101   :  { %v251_v58 = vmax.f32 %v194_v56, 0.0 }
 0x103   :  { %v275_v59 = vpack.c.bf16 %v251_v58, %v250_v57 }
 0x105   :  { %395 = vmatmul.bf16.gmra.mxu1 %v275_v59  ;;  %v223_v59 = vpop.f32.mrf.mxu3 }
 0x106   :  { %v196_v60 = vpop.f32.mrf.mxu0 }
 0x107   :  { %v197_v61 = vadd.f32 %v1393_v38, %v196_v60 }
 0x109   :  { %v252_v0 = vmax.f32 %v197_v61, 0.0 }
 0x10e   :  { %v198_v62 = vpop.f32.mrf.mxu0 }
 0x10f   :  { %v199_v63 = vadd.f32 %v1393_v38, %v198_v62 }
 0x111   :  { %v253_v1 = vmax.f32 %v199_v63, 0.0 }
 0x112   :  { %v361_v2 = vpop.f32.mrf.mxu1 }
 0x113   :  { %v276_v3 = vpack.c.bf16 %v253_v1, %v252_v0  ;;  %v362_v6 = vadd.f32 %v1490_v4, %v361_v2  ;;  %v226_v2 = vpop.f32.mrf.mxu3 }
 0x115   :  { %400 = vmatmul.bf16.gmra.mxu1 %v276_v3  ;;  %v441_v9 = vmax.f32 %v362_v6, 0.0  ;;  %v222_v3 = vadd.f32 %v1393_v38, %v221_v49 }
 0x116   :  { %v201_v5 = vpop.f32.mrf.mxu0 }
 0x117   :  { %v202_v10 = vadd.f32 %v1393_v38, %v201_v5  ;;  %v224_v5 = vadd.f32 %v1393_v38, %v223_v59 }
 0x119   :  { %v254_v15 = vmax.f32 %v202_v10, 0.0  ;;  %v263_v10 = vmax.f32 %v224_v5, 0.0 }
 0x11a   :  { %v363_v7 = vpop.f32.mrf.mxu1 }
 0x11b   :  { %v364_v8 = vadd.f32 %v1490_v4, %v363_v7 }
 0x11d   :  { %v442_v11 = vmax.f32 %v364_v8, 0.0 }
 0x11e   :  { %v203_v12 = vpop.f32.mrf.mxu0 }
 0x11f   :  { %v204_v13 = vadd.f32 %v1393_v38, %v203_v12  ;;  %v473_v14 = vpack.c.bf16 %v442_v11, %v441_v9  ;;  %v262_v9 = vmax.f32 %v222_v3, 0.0 }
 0x121   :  { %v255_v16 = vmax.f32 %v204_v13, 0.0  ;;  %565 = vmatmul.bf16.vlgmr.msra.gmra.mxu2 %v473_v14  ;;  %v281_v13 = vpack.c.bf16 %v263_v10, %v262_v9  ;;  %v228_v14 = vpop.f32.mrf.mxu3 }
 0x122   :  { %v366_v17 = vpop.f32.mrf.mxu1 }
 0x123   :  { %v277_v18 = vpack.c.bf16 %v255_v16, %v254_v15  ;;  %v367_v20 = vadd.f32 %v1490_v4, %v366_v17  ;;  %v227_v17 = vadd.f32 %v1393_v38, %v226_v2 }
 0x125   :  { %405 = vmatmul.bf16.gmra.mxu1 %v277_v18  ;;  %v443_v23 = vmax.f32 %v367_v20, 0.0  ;;  %v229_v18 = vadd.f32 %v1393_v38, %v228_v14 }
 0x126   :  { %v206_v19 = vpop.f32.mrf.mxu0 }
 0x127   :  { %v207_v24 = vadd.f32 %v1393_v38, %v206_v19 }
 0x129   :  { %v256_v29 = vmax.f32 %v207_v24, 0.0  ;;  %v265_v24 = vmax.f32 %v229_v18, 0.0 }
 0x12a   :  { %v368_v21 = vpop.f32.mrf.mxu1 }
 0x12b   :  { %v369_v22 = vadd.f32 %v1490_v4, %v368_v21 }
 0x12d   :  { %v444_v25 = vmax.f32 %v369_v22, 0.0  ;;  %v231_v22 = vpop.f32.mrf.mxu3 }
 0x12e   :  { %v208_v26 = vpop.f32.mrf.mxu0 }
 0x12f   :  { %v209_v27 = vadd.f32 %v1393_v38, %v208_v26  ;;  %v474_v28 = vpack.c.bf16 %v444_v25, %v443_v23  ;;  %v264_v23 = vmax.f32 %v227_v17, 0.0 }
 0x131   :  { %v257_v30 = vmax.f32 %v209_v27, 0.0  ;;  %570 = vmatmul.bf16.gmra.mxu2 %v474_v28  ;;  %v282_v27 = vpack.c.bf16 %v265_v24, %v264_v23 }
 0x132   :  { %v371_v31 = vpop.f32.mrf.mxu1 }
 0x133   :  { %v278_v32 = vpack.c.bf16 %v257_v30, %v256_v29  ;;  %v372_v34 = vadd.f32 %v1490_v4, %v371_v31  ;;  %v232_v31 = vadd.f32 %v1393_v38, %v231_v22 }
 0x135   :  { %410 = vmatmul.bf16.gmra.mxu1 %v278_v32  ;;  %v445_v37 = vmax.f32 %v372_v34, 0.0  ;;  %v233_v28 = vpop.f32.mrf.mxu3 }
 0x136   :  { %v211_v33 = vpop.f32.mrf.mxu0  ;;  %v234_v32 = vadd.f32 %v1393_v38, %v233_v28 }
 0x137   :  { %v212_v39 = vadd.f32 %v1393_v38, %v211_v33 }
 0x139   :  { %v258_v44 = vmax.f32 %v212_v39, 0.0 }
 0x13a   :  { %v373_v35 = vpop.f32.mrf.mxu1 }
 0x13b   :  { %v374_v36 = vadd.f32 %v1490_v4, %v373_v35 }
 0x13d   :  { %v446_v40 = vmax.f32 %v374_v36, 0.0  ;;  %v266_v36 = vmax.f32 %v232_v31, 0.0 }
 0x13e   :  { %v213_v41 = vpop.f32.mrf.mxu0 }
 0x13f   :  { %v214_v42 = vadd.f32 %v1393_v38, %v213_v41  ;;  %v475_v43 = vpack.c.bf16 %v446_v40, %v445_v37  ;;  %v267_v37 = vmax.f32 %v234_v32, 0.0 }
 0x141   :  { %v259_v45 = vmax.f32 %v214_v42, 0.0  ;;  %575 = vmatmul.bf16.gmra.mxu2 %v475_v43  ;;  %v283_v41 = vpack.c.bf16 %v267_v37, %v266_v36 }
 0x142   :  { %v376_v46 = vpop.f32.mrf.mxu1 }
 0x143   :  { %v279_v47 = vpack.c.bf16 %v259_v45, %v258_v44  ;;  %v377_v50 = vadd.f32 %v1490_v4, %v376_v46 }
 0x145   :  { %415 = vmatmul.bf16.gmra.mxu1 %v279_v47  ;;  %v447_v53 = vmax.f32 %v377_v50, 0.0 }
 0x146   :  { %v216_v48 = vpop.f32.mrf.mxu0 }
 0x147   :  { %v217_v54 = vadd.f32 %v1393_v38, %v216_v48 }
 0x149   :  { %v260_v60 = vmax.f32 %v217_v54, 0.0  ;;  %v1527_v54 = vld [vmem:[%s1839_s6] ss:$0 sm:$0xff] }
 0x14a   :  { %v378_v51 = vpop.f32.mrf.mxu1 }
 0x14b   :  { %v379_v52 = vadd.f32 %v1490_v4, %v378_v51 }
 0x14d   :  { %v448_v55 = vmax.f32 %v379_v52, 0.0 }
 0x14e   :  { %v218_v56 = vpop.f32.mrf.mxu0 }
 0x14f   :  { %v219_v57 = vadd.f32 %v1393_v38, %v218_v56  ;;  %v476_v58 = vpack.c.bf16 %v448_v55, %v447_v53 }
 0x151   :  { %v261_v61 = vmax.f32 %v219_v57, 0.0  ;;  %580 = vmatmul.bf16.gmra.mxu2 %v476_v58 }
 0x152   :  { %v381_v62 = vpop.f32.mrf.mxu1 }
 0x153   :  { %v280_v63 = vpack.c.bf16 %v261_v61, %v260_v60  ;;  %v382_v0 = vadd.f32 %v1490_v4, %v381_v62 }
 0x155   :  { %420 = vmatmul.bf16.vlgmr.msrb.gmra.mxu3 %v280_v63  ;;  %v449_v7 = vmax.f32 %v382_v0, 0.0 }
 0x15a   :  { %v383_v1 = vpop.f32.mrf.mxu1 }
 0x15b   :  { %v384_v6 = vadd.f32 %v1490_v4, %v383_v1 }
 0x15d   :  { %v450_v8 = vmax.f32 %v384_v6, 0.0 }
 0x15f   :  { %v477_v11 = vpack.c.bf16 %v450_v8, %v449_v7 }
 0x161   :  { %585 = vmatmul.bf16.gmra.mxu2 %v477_v11 }
 0x162   :  { %v386_v12 = vpop.f32.mrf.mxu1 }
 0x163   :  { %v387_v15 = vadd.f32 %v1490_v4, %v386_v12 }
 0x165   :  { %425 = vmatmul.bf16.gmra.mxu3 %v281_v13  ;;  %v451_v20 = vmax.f32 %v387_v15, 0.0 }
 0x16a   :  { %v388_v16 = vpop.f32.mrf.mxu1 }
 0x16b   :  { %v389_v19 = vadd.f32 %v1490_v4, %v388_v16 }
 0x16d   :  { %v452_v21 = vmax.f32 %v389_v19, 0.0 }
 0x16f   :  { %v478_v25 = vpack.c.bf16 %v452_v21, %v451_v20 }
 0x171   :  { %590 = vmatmul.bf16.gmra.mxu2 %v478_v25 }
 0x172   :  { %v391_v26 = vpop.f32.mrf.mxu1 }
 0x173   :  { %v392_v29 = vadd.f32 %v1490_v4, %v391_v26 }
 0x175   :  { %430 = vmatmul.bf16.gmra.mxu3 %v282_v27  ;;  %v453_v34 = vmax.f32 %v392_v29, 0.0 }
 0x17a   :  { %v393_v30 = vpop.f32.mrf.mxu1 }
 0x17b   :  { %v394_v33 = vadd.f32 %v1490_v4, %v393_v30 }
 0x17d   :  { %v454_v35 = vmax.f32 %v394_v33, 0.0 }
 0x17f   :  { %v479_v39 = vpack.c.bf16 %v454_v35, %v453_v34 }
 0x181   :  { %595 = vmatmul.bf16.gmra.mxu2 %v479_v39 }
 0x182   :  { %v396_v40 = vpop.f32.mrf.mxu1 }
 0x183   :  { %v397_v42 = vadd.f32 %v1490_v4, %v396_v40 }
 0x185   :  { %435 = vmatmul.bf16.gmra.mxu3 %v283_v41  ;;  %v455_v45 = vmax.f32 %v397_v42, 0.0 }
 0x18a   :  { %v398_v43 = vpop.f32.mrf.mxu1 }
 0x18b   :  { %v399_v44 = vadd.f32 %v1490_v4, %v398_v43 }
 0x18d   :  { %v456_v46 = vmax.f32 %v399_v44, 0.0 }
 0x18f   :  { %v480_v47 = vpack.c.bf16 %v456_v46, %v455_v45 }
 0x191   :  { %600 = vmatmul.bf16.gmra.mxu2 %v480_v47 }
 0x192   :  { %v401_v38 = vpop.f32.mrf.mxu1 }
 0x193   :  { %v402_v48 = vadd.f32 %v1490_v4, %v401_v38 }
 0x195   :  { %v457_v51 = vmax.f32 %v402_v48, 0.0 }
 0x19a   :  { %v403_v49 = vpop.f32.mrf.mxu1 }
 0x19b   :  { %v404_v50 = vadd.f32 %v1490_v4, %v403_v49 }
 0x19d   :  { %v458_v52 = vmax.f32 %v404_v50, 0.0 }
 0x19f   :  { %v481_v53 = vpack.c.bf16 %v458_v52, %v457_v51 }
 0x1a1   :  { %605 = vmatmul.bf16.gmra.mxu2 %v481_v53 }
 0x1a2   :  { %v406_v55 = vpop.f32.mrf.mxu1 }
 0x1a3   :  { %v407_v58 = vadd.f32 %v1490_v4, %v406_v55 }
 0x1a4   :  { %v566_v56 = vpop.f32.mrf.mxu2 }
 0x1a5   :  { %v567_v57 = vadd.f32 %v1527_v54, %v566_v56  ;;  %v459_v62 = vmax.f32 %v407_v58, 0.0 }
 0x1a7   :  { %710 = vxpose.xlu1.b32.start [1/16] %v567_v57, 128 }
 0x1aa   :  { %v408_v59 = vpop.f32.mrf.mxu1 }
 0x1ab   :  { %v409_v60 = vadd.f32 %v1490_v4, %v408_v59 }
 0x1ac   :  { %v568_v61 = vpop.f32.mrf.mxu2 }
 0x1ad   :  { %v460_v63 = vmax.f32 %v409_v60, 0.0  ;;  %v569_v0 = vadd.f32 %v1527_v54, %v568_v61 }
 0x1af   :  { %v1112_v1 = vpack.c.bf16 %v569_v0, %v567_v57  ;;  %711 = vxpose.xlu1.b32.cont [2/16] %v569_v0, 128  ;;  %v482_v2 = vpack.c.bf16 %v460_v63, %v459_v62 }
 0x1b1   :  { %1113 = vst [vmem:[%s1841_s8] sm:$0xff] %v1112_v1   ;;  %610 = vmatmul.bf16.gmra.mxu2 %v482_v2 }
 0x1b2   :  { %v411_v3 = vpop.f32.mrf.mxu1 }
 0x1b3   :  { %v412_v7 = vadd.f32 %v1490_v4, %v411_v3 }
 0x1b4   :  { %v571_v5 = vpop.f32.mrf.mxu2 }
 0x1b5   :  { %v572_v6 = vadd.f32 %v1527_v54, %v571_v5  ;;  %v461_v11 = vmax.f32 %v412_v7, 0.0 }
 0x1b7   :  { %712 = vxpose.xlu1.b32.cont [3/16] %v572_v6, 128 }
 0x1ba   :  { %v413_v8 = vpop.f32.mrf.mxu1 }
 0x1bb   :  { %v414_v9 = vadd.f32 %v1490_v4, %v413_v8 }
 0x1bc   :  { %v573_v10 = vpop.f32.mrf.mxu2 }
 0x1bd   :  { %v462_v12 = vmax.f32 %v414_v9, 0.0  ;;  %v574_v13 = vadd.f32 %v1527_v54, %v573_v10 }
 0x1bf   :  { %v1117_v14 = vpack.c.bf16 %v574_v13, %v572_v6  ;;  %713 = vxpose.xlu1.b32.cont [4/16] %v574_v13, 128  ;;  %v483_v15 = vpack.c.bf16 %v462_v12, %v461_v11 }
 0x1c1   :  { %1189 = vst [vmem:[%s1841_s8 + $0x8] sm:$0xff] %v1117_v14   ;;  %615 = vmatmul.bf16.gmra.mxu2 %v483_v15 }
 0x1c2   :  { %v416_v16 = vpop.f32.mrf.mxu1 }
 0x1c3   :  { %v417_v19 = vadd.f32 %v1490_v4, %v416_v16 }
 0x1c4   :  { %v576_v17 = vpop.f32.mrf.mxu2 }
 0x1c5   :  { %v577_v18 = vadd.f32 %v1527_v54, %v576_v17  ;;  %v463_v23 = vmax.f32 %v417_v19, 0.0 }
 0x1c7   :  { %714 = vxpose.xlu1.b32.cont [5/16] %v577_v18, 128 }
 0x1ca   :  { %v418_v20 = vpop.f32.mrf.mxu1 }
 0x1cb   :  { %v419_v21 = vadd.f32 %v1490_v4, %v418_v20 }
 0x1cc   :  { %v578_v22 = vpop.f32.mrf.mxu2 }
 0x1cd   :  { %v464_v24 = vmax.f32 %v419_v21, 0.0  ;;  %v579_v25 = vadd.f32 %v1527_v54, %v578_v22 }
 0x1cf   :  { %v1122_v26 = vpack.c.bf16 %v579_v25, %v577_v18  ;;  %715 = vxpose.xlu1.b32.cont [6/16] %v579_v25, 128  ;;  %v484_v27 = vpack.c.bf16 %v464_v24, %v463_v23 }
 0x1d1   :  { %1190 = vst [vmem:[%s1841_s8 + $0x10] sm:$0xff] %v1122_v26   ;;  %620 = vmatmul.bf16.gmra.mxu2 %v484_v27 }
 0x1d4   :  { %v581_v28 = vpop.f32.mrf.mxu2 }
 0x1d5   :  { %v582_v29 = vadd.f32 %v1527_v54, %v581_v28 }
 0x1d7   :  { %716 = vxpose.xlu1.b32.cont [7/16] %v582_v29, 128 }
 0x1d8   :  { %v421_v30 = vpop.f32.mrf.mxu3 }
 0x1d9   :  { %v422_v33 = vadd.f32 %v1490_v4, %v421_v30 }
 0x1db   :  { %v465_v37 = vmax.f32 %v422_v33, 0.0 }
 0x1dc   :  { %v583_v31 = vpop.f32.mrf.mxu2 }
 0x1dd   :  { %v584_v32 = vadd.f32 %v1527_v54, %v583_v31 }
 0x1df   :  { %v1127_v34 = vpack.c.bf16 %v584_v32, %v582_v29  ;;  %717 = vxpose.xlu1.b32.cont [8/16] %v584_v32, 128 }
 0x1e0   :  { %v423_v35 = vpop.f32.mrf.mxu3 }
 0x1e1   :  { %1191 = vst [vmem:[%s1841_s8 + $0x18] sm:$0xff] %v1127_v34   ;;  %v424_v36 = vadd.f32 %v1490_v4, %v423_v35 }
 0x1e3   :  { %v466_v39 = vmax.f32 %v424_v36, 0.0 }
 0x1e4   :  { %v586_v40 = vpop.f32.mrf.mxu2 }
 0x1e5   :  { %v485_v41 = vpack.c.bf16 %v466_v39, %v465_v37  ;;  %v587_v42 = vadd.f32 %v1527_v54, %v586_v40 }
 0x1e7   :  { %625 = vmatmul.bf16.vlgmr.msra.gmra.mxu3 %v485_v41  ;;  %718 = vxpose.xlu1.b32.cont [9/16] %v587_v42, 128 }
 0x1e8   :  { %v426_v43 = vpop.f32.mrf.mxu3 }
 0x1e9   :  { %v427_v46 = vadd.f32 %v1490_v4, %v426_v43 }
 0x1eb   :  { %v467_v49 = vmax.f32 %v427_v46, 0.0 }
 0x1ec   :  { %v588_v44 = vpop.f32.mrf.mxu2 }
 0x1ed   :  { %v589_v45 = vadd.f32 %v1527_v54, %v588_v44 }
 0x1ef   :  { %v1132_v47 = vpack.c.bf16 %v589_v45, %v587_v42  ;;  %719 = vxpose.xlu1.b32.cont [10/16] %v589_v45, 128 }
 0x1f0   :  { %v428_v38 = vpop.f32.mrf.mxu3 }
 0x1f1   :  { %1192 = vst [vmem:[%s1841_s8 + $0x20] sm:$0xff] %v1132_v47   ;;  %v429_v48 = vadd.f32 %v1490_v4, %v428_v38 }
 0x1f3   :  { %v468_v50 = vmax.f32 %v429_v48, 0.0 }
 0x1f4   :  { %v591_v51 = vpop.f32.mrf.mxu2 }
 0x1f5   :  { %v592_v52 = vadd.f32 %v1527_v54, %v591_v51  ;;  %v486_v53 = vpack.c.bf16 %v468_v50, %v467_v49 }
 0x1f7   :  { %630 = vmatmul.bf16.gmra.mxu3 %v486_v53  ;;  %720 = vxpose.xlu1.b32.cont [11/16] %v592_v52, 128 }
 0x1f8   :  { %v431_v55 = vpop.f32.mrf.mxu3 }
 0x1f9   :  { %v432_v58 = vadd.f32 %v1490_v4, %v431_v55 }
 0x1fb   :  { %v469_v62 = vmax.f32 %v432_v58, 0.0 }
 0x1fc   :  { %v593_v56 = vpop.f32.mrf.mxu2 }
 0x1fd   :  { %v594_v57 = vadd.f32 %v1527_v54, %v593_v56 }
 0x1ff   :  { %v1137_v59 = vpack.c.bf16 %v594_v57, %v592_v52  ;;  %721 = vxpose.xlu1.b32.cont [12/16] %v594_v57, 128 }
 0x200   :  { %v433_v60 = vpop.f32.mrf.mxu3 }
 0x201   :  { %1193 = vst [vmem:[%s1841_s8 + $0x28] sm:$0xff] %v1137_v59   ;;  %v434_v61 = vadd.f32 %v1490_v4, %v433_v60 }
 0x203   :  { %v470_v63 = vmax.f32 %v434_v61, 0.0 }
 0x204   :  { %v596_v0 = vpop.f32.mrf.mxu2 }
 0x205   :  { %v597_v1 = vadd.f32 %v1527_v54, %v596_v0  ;;  %v487_v2 = vpack.c.bf16 %v470_v63, %v469_v62 }
 0x207   :  { %635 = vmatmul.bf16.gmra.mxu3 %v487_v2  ;;  %722 = vxpose.xlu1.b32.cont [13/16] %v597_v1, 128 }
 0x208   :  { %v436_v3 = vpop.f32.mrf.mxu3 }
 0x209   :  { %v437_v7 = vadd.f32 %v1490_v4, %v436_v3 }
 0x20b   :  { %v471_v11 = vmax.f32 %v437_v7, 0.0 }
 0x20c   :  { %v598_v5 = vpop.f32.mrf.mxu2 }
 0x20d   :  { %v599_v6 = vadd.f32 %v1527_v54, %v598_v5 }
 0x20f   :  { %v1142_v8 = vpack.c.bf16 %v599_v6, %v597_v1  ;;  %723 = vxpose.xlu1.b32.cont [14/16] %v599_v6, 128 }
 0x210   :  { %v438_v9 = vpop.f32.mrf.mxu3 }
 0x211   :  { %1194 = vst [vmem:[%s1841_s8 + $0x30] sm:$0xff] %v1142_v8   ;;  %v439_v10 = vadd.f32 %v1490_v4, %v438_v9 }
 0x213   :  { %v472_v12 = vmax.f32 %v439_v10, 0.0 }
 0x214   :  { %v601_v13 = vpop.f32.mrf.mxu2 }
 0x215   :  { %v602_v14 = vadd.f32 %v1527_v54, %v601_v13  ;;  %v488_v15 = vpack.c.bf16 %v472_v12, %v471_v11 }
 0x217   :  { %640 = vmatmul.bf16.gmra.mxu3 %v488_v15  ;;  %724 = vxpose.xlu1.b32.cont [15/16] %v602_v14, 128 }
 0x21c   :  { %v603_v16 = vpop.f32.mrf.mxu2 }
 0x21d   :  { %v604_v17 = vadd.f32 %v1527_v54, %v603_v16 }
 0x21f   :  { %v1147_v18 = vpack.c.bf16 %v604_v17, %v602_v14  ;;  %725 = vxpose.xlu1.b32.end [16/16] %v604_v17, 128 }
 0x221   :  { %1195 = vst [vmem:[%s1841_s8 + $0x38] sm:$0xff] %v1147_v18  }
 0x224   :  { %v606_v19 = vpop.f32.mrf.mxu2 }
 0x225   :  { %v607_v4 = vadd.f32 %v1527_v54, %v606_v19 }
 0x227   :  { %742 = vxpose.xlu0.b32.start [1/16] %v607_v4, 128 }
 0x22c   :  { %v608_v20 = vpop.f32.mrf.mxu2 }
 0x22d   :  { %v609_v21 = vadd.f32 %v1527_v54, %v608_v20 }
 0x22f   :  { %v1152_v22 = vpack.c.bf16 %v609_v21, %v607_v4  ;;  %743 = vxpose.xlu0.b32.cont [2/16] %v609_v21, 128 }
 0x231   :  { %1196 = vst [vmem:[%s1841_s8 + $0x40] sm:$0xff] %v1152_v22  }
 0x234   :  { %v611_v23 = vpop.f32.mrf.mxu2 }
 0x235   :  { %v612_v24 = vadd.f32 %v1527_v54, %v611_v23 }
 0x237   :  { %744 = vxpose.xlu0.b32.cont [3/16] %v612_v24, 128 }
 0x23c   :  { %v613_v25 = vpop.f32.mrf.mxu2 }
 0x23d   :  { %v614_v26 = vadd.f32 %v1527_v54, %v613_v25 }
 0x23f   :  { %v1157_v27 = vpack.c.bf16 %v614_v26, %v612_v24  ;;  %745 = vxpose.xlu0.b32.cont [4/16] %v614_v26, 128 }
 0x241   :  { %1197 = vst [vmem:[%s1841_s8 + $0x48] sm:$0xff] %v1157_v27   ;;  %v774_v27 = vlaneseq }
 0x244   :  { %v616_v28 = vpop.f32.mrf.mxu2 }
 0x245   :  { %v617_v29 = vadd.f32 %v1527_v54, %v616_v28 }
 0x247   :  { %746 = vxpose.xlu0.b32.cont [5/16] %v617_v29, 128 }
 0x24b   :  { %v1594_v30 = vpop.trf.xlu1 }
 0x24c   :  { %v618_v31 = vpop.f32.mrf.mxu2 }
 0x24d   :  { %v619_v32 = vadd.f32 %v1527_v54, %v618_v31  ;;  %v1672_v31 = vshrl.u32 %v774_v27, 7 }
 0x24f   :  { %v1162_v33 = vpack.c.bf16 %v619_v32, %v617_v29  ;;  %747 = vxpose.xlu0.b32.cont [6/16] %v619_v32, 128 }
 0x251   :  { %1198 = vst [vmem:[%s1841_s8 + $0x50] sm:$0xff] %v1162_v33  }
 0x253   :  { %v1600_v34 = vpop.trf.xlu1 }
 0x254   :  { %v621_v35 = vpop.f32.mrf.mxu2 }
 0x255   :  { %v622_v36 = vadd.f32 %v1527_v54, %v621_v35 }
 0x257   :  { %748 = vxpose.xlu0.b32.cont [7/16] %v622_v36, 128 }
 0x25b   :  { %v1603_v37 = vpop.trf.xlu1 }
 0x25c   :  { %v623_v39 = vpop.f32.mrf.mxu2  ;;  %v791_v8 = vmax.f32 %v1594_v30, %v1603_v37 }
 0x25d   :  { %v624_v40 = vadd.f32 %v1527_v54, %v623_v39  ;;  %v1682_v39 = vadd.s32 16, %v1672_v31 }
 0x25f   :  { %v1167_v41 = vpack.c.bf16 %v624_v40, %v622_v36  ;;  %749 = vxpose.xlu0.b32.cont [8/16] %v624_v40, 128  ;;  %v1679_v36 = vadd.s32 8, %v1672_v31  ;;  %v1685_v40 = vadd.s32 24, %v1672_v31 }
 0x261   :  { %1199 = vst [vmem:[%s1841_s8 + $0x58] sm:$0xff] %v1167_v41   ;;  %v1688_v41 = vadd.s32 32, %v1672_v31 }
 0x263   :  { %v1609_v42 = vpop.trf.xlu1 }
 0x264   :  { %v792_v10 = vmax.f32 %v1600_v34, %v1609_v42 }
 0x26a   :  { %v626_v43 = vpop.f32.mrf.mxu3 }
 0x26b   :  { %v627_v44 = vadd.f32 %v1527_v54, %v626_v43  ;;  %v1612_v45 = vpop.trf.xlu1  ;;  %v1691_v43 = vadd.s32 40, %v1672_v31 }
 0x26c   :  { %v793_v11 = vmax.f32 %v791_v8, %v1612_v45 }
 0x26d   :  { %750 = vxpose.xlu0.b32.cont [9/16] %v627_v44, 128 }
 0x272   :  { %v628_v46 = vpop.f32.mrf.mxu3 }
 0x273   :  { %v629_v47 = vadd.f32 %v1527_v54, %v628_v46  ;;  %v1615_v38 = vpop.trf.xlu1  ;;  %v1705_v46 = vadd.s32 56, %v1672_v31 }
 0x275   :  { %v1172_v48 = vpack.c.bf16 %v629_v47, %v627_v44  ;;  %751 = vxpose.xlu0.b32.cont [10/16] %v629_v47, 128  ;;  %v1702_v44 = vadd.s32 48, %v1672_v31  ;;  %v1708_v47 = vadd.s32 64, %v1672_v31 }
 0x277   :  { %1200 = vst [vmem:[%s1841_s8 + $0x60] sm:$0xff] %v1172_v48  }
 0x27a   :  { %v631_v49 = vpop.f32.mrf.mxu3 }
 0x27b   :  { %v632_v50 = vadd.f32 %v1527_v54, %v631_v49  ;;  %v1621_v51 = vpop.trf.xlu1 }
 0x27c   :  { %v795_v12 = vmax.f32 %v793_v11, %v1621_v51 }
 0x27d   :  { %752 = vxpose.xlu0.b32.cont [11/16] %v632_v50, 128 }
 0x282   :  { %v633_v52 = vpop.f32.mrf.mxu3 }
 0x283   :  { %v634_v53 = vadd.f32 %v1527_v54, %v633_v52  ;;  %v1624_v55 = vpop.trf.xlu1 }
 0x285   :  { %v1177_v56 = vpack.c.bf16 %v634_v53, %v632_v50  ;;  %753 = vxpose.xlu0.b32.cont [12/16] %v634_v53, 128  ;;  %v1730_v53 = vadd.s32 96, %v1672_v31 }
 0x287   :  { %1201 = vst [vmem:[%s1841_s8 + $0x68] sm:$0xff] %v1177_v56   ;;  %v1733_v56 = vadd.s32 104, %v1672_v31 }
 0x28a   :  { %v636_v57 = vpop.f32.mrf.mxu3 }
 0x28b   :  { %v637_v58 = vadd.f32 %v1527_v54, %v636_v57  ;;  %v1630_v59 = vpop.trf.xlu1 }
 0x28c   :  { %v797_v15 = vmax.f32 %v795_v12, %v1630_v59 }
 0x28d   :  { %754 = vxpose.xlu0.b32.cont [13/16] %v637_v58, 128 }
 0x292   :  { %v638_v60 = vpop.f32.mrf.mxu3 }
 0x293   :  { %v639_v61 = vadd.f32 %v1527_v54, %v638_v60  ;;  %v1633_v62 = vpop.trf.xlu1 }
 0x295   :  { %v1182_v63 = vpack.c.bf16 %v639_v61, %v637_v58  ;;  %755 = vxpose.xlu0.b32.cont [14/16] %v639_v61, 128 }
 0x297   :  { %1202 = vst [vmem:[%s1841_s8 + $0x70] sm:$0xff] %v1182_v63  }
 0x29a   :  { %v641_v0 = vpop.f32.mrf.mxu3 }
 0x29b   :  { %v642_v1 = vadd.f32 %v1527_v54, %v641_v0  ;;  %v1639_v2 = vpop.trf.xlu1 }
 0x29c   :  { %v799_v17 = vmax.f32 %v797_v15, %v1639_v2 }
 0x29d   :  { %756 = vxpose.xlu0.b32.cont [15/16] %v642_v1, 128 }
 0x2a2   :  { %v643_v3 = vpop.f32.mrf.mxu3 }
 0x2a3   :  { %v644_v5 = vadd.f32 %v1527_v54, %v643_v3  ;;  %v1642_v6 = vpop.trf.xlu1  ;;  %v794_v54 = vmax.f32 %v792_v10, %v1615_v38 }
 0x2a5   :  { %v1187_v7 = vpack.c.bf16 %v644_v5, %v642_v1  ;;  %757 = vxpose.xlu0.b32.end [16/16] %v644_v5, 128  ;;  %v796_v14 = vmax.f32 %v794_v54, %v1624_v55 }
 0x2a7   :  { %1203 = vst [vmem:[%s1841_s8 + $0x78] sm:$0xff] %v1187_v7   ;;  %v798_v16 = vmax.f32 %v796_v14, %v1633_v62  ;;  %s1252_s8 = smov [#allocation2]  }
 0x2a8   :  { %s988_s14 = sshll.u32 %s1252_s8, 4  ;;  %s989_s14 = int_to_ptr.vmem [resolvable:$true] %s988_s14 }
 0x2a9   :  { %v800_v19 = vmax.f32 %v798_v16, %v1642_v6 }
 0x2ab   :  { %v1649_v9 = vpop.trf.xlu1 }
 0x2ac   :  { %v801_v4 = vmax.f32 %v799_v17, %v1649_v9 }
 0x2b3   :  { %v1656_v13 = vpop.trf.xlu1 }
 0x2b4   :  { %v802_v20 = vmax.f32 %v800_v19, %v1656_v13 }
 0x2bb   :  { %v1662_v18 = vpop.trf.xlu1 }
 0x2bc   :  { %v803_v21 = vmax.f32 %v801_v4, %v1662_v18 }
 0x2c3   :  { %v1668_v22 = vpop.trf.xlu1 }
 0x2c4   :  { %v804_v23 = vmax.f32 %v802_v20, %v1668_v22 }
 0x2c6   :  { %v805_v24 = vmax.f32 %v803_v21, %v804_v23 }
 0x2c8   :  { %v806_v25 = vrot.slane %v805_v24, 4 }
 0x2ca   :  { %v807_v26 = vmax.f32 %v805_v24, %v806_v25 }
 0x2cc   :  { %v808_v28 = vrot.slane %v807_v26, 2 }
 0x2ce   :  { %v809_v29 = vmax.f32 %v807_v26, %v808_v28 }
 0x2d0   :  { %v810_v32 = vrot.slane %v809_v29, 1 }
 0x2d1   :  { %v1674_v33 = vpop.trf.xlu0 }
 0x2d2   :  { %v1676_v35 = vmax.f32 %v809_v29, %v810_v32 }
 0x2d4   :  { %vm833_vm1 = vcmp.eq.f32.partialorder %v1594_v30, %v1676_v35  ;;  %vm835_vm2 = vcmp.eq.f32.partialorder %v1600_v34, %v1676_v35  ;;  %vm837_vm3 = vcmp.eq.f32.partialorder %v1603_v37, %v1676_v35  ;;  %vm839_vm4 = vcmp.eq.f32.partialorder %v1609_v42, %v1676_v35 }
 0x2d5   :  { %v1711_v30 = vadd.s32 72, %v1672_v31  ;;  %v1714_v34 = vadd.s32 80, %v1672_v31  ;;  %v1717_v37 = vadd.s32 88, %v1672_v31  ;;  %vm841_vm5 = vcmp.eq.f32.partialorder %v1612_v45, %v1676_v35 }
 0x2d6   :  { %vm843_vm6 = vcmp.eq.f32.partialorder %v1615_v38, %v1676_v35  ;;  %v865_v42 = vsel %vm833_vm1, %v1672_v31, 128  ;;  %v867_v48 = vsel %vm835_vm2, %v1679_v36, 128  ;;  %v869_v49 = vsel %vm837_vm3, %v1682_v39, 128 }
 0x2d7   :  { %v871_v50 = vsel %vm839_vm4, %v1685_v40, 128  ;;  %vm845_vm7 = vcmp.eq.f32.partialorder %v1621_v51, %v1676_v35  ;;  %vm847_vm8 = vcmp.eq.f32.partialorder %v1624_v55, %v1676_v35  ;;  %v1740_v45 = vadd.s32 112, %v1672_v31 }
 0x2d8   :  { %v1743_v38 = vadd.s32 120, %v1672_v31  ;;  %v873_v57 = vsel %vm841_vm5, %v1688_v41, 128  ;;  %v875_v58 = vsel %vm843_vm6, %v1691_v43, 128  ;;  %vm849_vm9 = vcmp.eq.f32.partialorder %v1630_v59, %v1676_v35 }
 0x2d9   :  { %v1727_v52 = vpop.trf.xlu0  ;;  %vm851_vm10 = vcmp.eq.f32.partialorder %v1633_v62, %v1676_v35  ;;  %vm897_vm11 = vcmp.lt.s32.totalorder %v865_v42, %v869_v49  ;;  %vm899_vm12 = vcmp.lt.s32.totalorder %v867_v48, %v871_v50  ;;  %v877_v51 = vsel %vm845_vm7, %v1702_v44, 128 }
 0x2da   :  { %v879_v55 = vsel %vm847_vm8, %v1705_v46, 128  ;;  %v898_v60 = vsel %vm897_vm11, %v865_v42, %v869_v49  ;;  %v900_v61 = vsel %vm899_vm12, %v867_v48, %v871_v50  ;;  %vm853_vm13 = vcmp.eq.f32.partialorder %v1639_v2, %v1676_v35 }
 0x2db   :  { %vm855_vm14 = vcmp.eq.f32.partialorder %v1642_v6, %v1676_v35  ;;  %vm901_vm15 = vcmp.lt.s32.totalorder %v898_v60, %v873_v57  ;;  %vm903_vm0 = vcmp.lt.s32.totalorder %v900_v61, %v875_v58  ;;  %v881_v59 = vsel %vm849_vm9, %v1708_v47, 128 }
 0x2dc   :  { %v883_v62 = vsel %vm851_vm10, %v1711_v30, 128  ;;  %v902_v63 = vsel %vm901_vm15, %v898_v60, %v873_v57  ;;  %v904_v0 = vsel %vm903_vm0, %v900_v61, %v875_v58  ;;  %vm857_vm1 = vcmp.eq.f32.partialorder %v1649_v9, %v1676_v35 }
 0x2dd   :  { %vm859_vm2 = vcmp.eq.f32.partialorder %v1656_v13, %v1676_v35  ;;  %vm905_vm3 = vcmp.lt.s32.totalorder %v902_v63, %v877_v51  ;;  %vm907_vm4 = vcmp.lt.s32.totalorder %v904_v0, %v879_v55  ;;  %v885_v1 = vsel %vm853_vm13, %v1714_v34, 128 }
 0x2de   :  { %v887_v2 = vsel %vm855_vm14, %v1717_v37, 128  ;;  %v906_v3 = vsel %vm905_vm3, %v902_v63, %v877_v51  ;;  %v908_v5 = vsel %vm907_vm4, %v904_v0, %v879_v55  ;;  %vm861_vm5 = vcmp.eq.f32.partialorder %v1662_v18, %v1676_v35 }
 0x2df   :  { %vm863_vm6 = vcmp.eq.f32.partialorder %v1668_v22, %v1676_v35  ;;  %vm909_vm7 = vcmp.lt.s32.totalorder %v906_v3, %v881_v59  ;;  %vm911_vm8 = vcmp.lt.s32.totalorder %v908_v5, %v883_v62  ;;  %v889_v7 = vsel %vm857_vm1, %v1730_v53, 128 }
 0x2e0   :  { %v891_v8 = vsel %vm859_vm2, %v1733_v56, 128  ;;  %v910_v9 = vsel %vm909_vm7, %v906_v3, %v881_v59  ;;  %v912_v10 = vsel %vm911_vm8, %v908_v5, %v883_v62  ;;  %v893_v11 = vsel %vm861_vm5, %v1740_v45, 128 }
 0x2e1   :  { %v1765_v6 = vpop.trf.xlu0  ;;  %vm913_vm9 = vcmp.lt.s32.totalorder %v910_v9, %v885_v1  ;;  %vm915_vm10 = vcmp.lt.s32.totalorder %v912_v10, %v887_v2  ;;  %v895_v54 = vsel %vm863_vm6, %v1743_v38, 128 }
 0x2e2   :  { %v914_v12 = vsel %vm913_vm9, %v910_v9, %v885_v1  ;;  %v916_v13 = vsel %vm915_vm10, %v912_v10, %v887_v2  ;;  %v812_v32 = vmax.f32 %v1674_v33, %v1765_v6 }
 0x2e3   :  { %vm917_vm11 = vcmp.lt.s32.totalorder %v914_v12, %v889_v7  ;;  %vm919_vm12 = vcmp.lt.s32.totalorder %v916_v13, %v891_v8 }
 0x2e4   :  { %v918_v14 = vsel %vm917_vm11, %v914_v12, %v889_v7  ;;  %v920_v15 = vsel %vm919_vm12, %v916_v13, %v891_v8 }
 0x2e5   :  { %vm921_vm13 = vcmp.lt.s32.totalorder %v918_v14, %v893_v11  ;;  %vm923_vm14 = vcmp.lt.s32.totalorder %v920_v15, %v895_v54 }
 0x2e6   :  { %v922_v16 = vsel %vm921_vm13, %v918_v14, %v893_v11  ;;  %v924_v17 = vsel %vm923_vm14, %v920_v15, %v895_v54 }
 0x2e7   :  { %vm925_vm15 = vcmp.lt.s32.totalorder %v922_v16, %v924_v17 }
 0x2e8   :  { %v926_v19 = vsel %vm925_vm15, %v922_v16, %v924_v17 }
 0x2e9   :  { %v761_v18 = vpop.trf.xlu0  ;;  %v927_v10 = vrot.slane %v926_v19, 4 }
 0x2ea   :  { %v813_v35 = vmax.f32 %v1727_v52, %v761_v18 }
 0x2eb   :  { %vm928_vm4 = vcmp.lt.s32.totalorder %v926_v19, %v927_v10 }
 0x2ec   :  { %v929_v14 = vsel %vm928_vm4, %v926_v19, %v927_v10 }
 0x2f1   :  { %v762_v4 = vpop.trf.xlu0 }
 0x2f2   :  { %v814_v42 = vmax.f32 %v812_v32, %v762_v4 }
 0x2f9   :  { %v763_v20 = vpop.trf.xlu0 }
 0x2fa   :  { %v815_v48 = vmax.f32 %v813_v35, %v763_v20 }
 0x301   :  { %v764_v21 = vpop.trf.xlu0 }
 0x302   :  { %v816_v50 = vmax.f32 %v814_v42, %v764_v21 }
 0x309   :  { %v765_v22 = vpop.trf.xlu0 }
 0x30a   :  { %v817_v57 = vmax.f32 %v815_v48, %v765_v22 }
 0x311   :  { %v1775_v23 = vpop.trf.xlu0 }
 0x312   :  { %v818_v58 = vmax.f32 %v816_v50, %v1775_v23 }
 0x319   :  { %v1777_v24 = vpop.trf.xlu0 }
 0x31a   :  { %v819_v51 = vmax.f32 %v817_v57, %v1777_v24 }
 0x321   :  { %v1779_v25 = vpop.trf.xlu0 }
 0x322   :  { %v820_v55 = vmax.f32 %v818_v58, %v1779_v25 }
 0x329   :  { %v1781_v26 = vpop.trf.xlu0 }
 0x32a   :  { %v821_v60 = vmax.f32 %v819_v51, %v1781_v26 }
 0x331   :  { %v1783_v28 = vpop.trf.xlu0 }
 0x332   :  { %v822_v61 = vmax.f32 %v820_v55, %v1783_v28 }
 0x339   :  { %v1785_v29 = vpop.trf.xlu0 }
 0x33a   :  { %v823_v59 = vmax.f32 %v821_v60, %v1785_v29 }
 0x341   :  { %v1790_v49 = vpop.trf.xlu0 }
 0x342   :  { %v824_v63 = vmax.f32 %v822_v61, %v1790_v49 }
 0x349   :  { %v1798_v62 = vpop.trf.xlu0 }
 0x34a   :  { %v825_v0 = vmax.f32 %v823_v59, %v1798_v62 }
 0x34c   :  { %v826_v1 = vmax.f32 %v824_v63, %v825_v0 }
 0x34e   :  { %v827_v2 = vrot.slane %v826_v1, 4 }
 0x350   :  { %v828_v3 = vmax.f32 %v826_v1, %v827_v2 }
 0x352   :  { %v829_v5 = vrot.slane %v828_v3, 2 }
 0x354   :  { %v830_v7 = vmax.f32 %v828_v3, %v829_v5 }
 0x356   :  { %v831_v8 = vrot.slane %v830_v7, 1 }
 0x358   :  { %v832_v9 = vmax.f32 %v830_v7, %v831_v8 }
 0x35a   :  { %vm834_vm0 = vcmp.eq.f32.partialorder %v1674_v33, %v832_v9  ;;  %vm836_vm1 = vcmp.eq.f32.partialorder %v1727_v52, %v832_v9  ;;  %vm838_vm2 = vcmp.eq.f32.partialorder %v1765_v6, %v832_v9  ;;  %vm840_vm3 = vcmp.eq.f32.partialorder %v761_v18, %v832_v9 }
 0x35b   :  { %v866_v11 = vsel %vm834_vm0, %v1672_v31, 128  ;;  %v868_v54 = vsel %vm836_vm1, %v1679_v36, 128  ;;  %v870_v12 = vsel %vm838_vm2, %v1682_v39, 128  ;;  %v872_v13 = vsel %vm840_vm3, %v1685_v40, 128 }
 0x35c   :  { %vm842_vm5 = vcmp.eq.f32.partialorder %v762_v4, %v832_v9  ;;  %vm844_vm6 = vcmp.eq.f32.partialorder %v763_v20, %v832_v9  ;;  %vm846_vm7 = vcmp.eq.f32.partialorder %v764_v21, %v832_v9  ;;  %vm848_vm8 = vcmp.eq.f32.partialorder %v765_v22, %v832_v9 }
 0x35d   :  { %vm936_vm9 = vcmp.lt.s32.totalorder %v866_v11, %v870_v12  ;;  %vm938_vm10 = vcmp.lt.s32.totalorder %v868_v54, %v872_v13  ;;  %v874_v33 = vsel %vm842_vm5, %v1688_v41, 128  ;;  %v876_v52 = vsel %vm844_vm6, %v1691_v43, 128 }
 0x35e   :  { %v937_v6 = vsel %vm936_vm9, %v866_v11, %v870_v12  ;;  %v939_v15 = vsel %vm938_vm10, %v868_v54, %v872_v13  ;;  %vm850_vm11 = vcmp.eq.f32.partialorder %v1775_v23, %v832_v9  ;;  %vm852_vm12 = vcmp.eq.f32.partialorder %v1777_v24, %v832_v9 }
 0x35f   :  { %vm940_vm13 = vcmp.lt.s32.totalorder %v937_v6, %v874_v33  ;;  %vm942_vm14 = vcmp.lt.s32.totalorder %v939_v15, %v876_v52  ;;  %v878_v31 = vsel %vm846_vm7, %v1702_v44, 128  ;;  %v880_v36 = vsel %vm848_vm8, %v1705_v46, 128 }
 0x360   :  { %v941_v39 = vsel %vm940_vm13, %v937_v6, %v874_v33  ;;  %v943_v40 = vsel %vm942_vm14, %v939_v15, %v876_v52  ;;  %vm854_vm15 = vcmp.eq.f32.partialorder %v1779_v25, %v832_v9  ;;  %vm856_vm0 = vcmp.eq.f32.partialorder %v1781_v26, %v832_v9 }
 0x361   :  { %vm944_vm1 = vcmp.lt.s32.totalorder %v941_v39, %v878_v31  ;;  %vm946_vm2 = vcmp.lt.s32.totalorder %v943_v40, %v880_v36  ;;  %v882_v41 = vsel %vm850_vm11, %v1708_v47, 128  ;;  %v884_v43 = vsel %vm852_vm12, %v1711_v30, 128 }
 0x362   :  { %v945_v16 = vsel %vm944_vm1, %v941_v39, %v878_v31  ;;  %v947_v17 = vsel %vm946_vm2, %v943_v40, %v880_v36  ;;  %vm858_vm3 = vcmp.eq.f32.partialorder %v1783_v28, %v832_v9  ;;  %vm860_vm4 = vcmp.eq.f32.partialorder %v1785_v29, %v832_v9 }
 0x363   :  { %vm948_vm5 = vcmp.lt.s32.totalorder %v945_v16, %v882_v41  ;;  %vm950_vm6 = vcmp.lt.s32.totalorder %v947_v17, %v884_v43  ;;  %v886_v44 = vsel %vm854_vm15, %v1714_v34, 128  ;;  %v888_v46 = vsel %vm856_vm0, %v1717_v37, 128 }
 0x364   :  { %v949_v18 = vsel %vm948_vm5, %v945_v16, %v882_v41  ;;  %v951_v19 = vsel %vm950_vm6, %v947_v17, %v884_v43  ;;  %vm862_vm7 = vcmp.eq.f32.partialorder %v1790_v49, %v832_v9  ;;  %vm864_vm8 = vcmp.eq.f32.partialorder %v1798_v62, %v832_v9 }
 0x365   :  { %vm952_vm9 = vcmp.lt.s32.totalorder %v949_v18, %v886_v44  ;;  %vm954_vm10 = vcmp.lt.s32.totalorder %v951_v19, %v888_v46  ;;  %v890_v47 = vsel %vm858_vm3, %v1730_v53, 128  ;;  %v892_v30 = vsel %vm860_vm4, %v1733_v56, 128 }
 0x366   :  { %v953_v4 = vsel %vm952_vm9, %v949_v18, %v886_v44  ;;  %v955_v20 = vsel %vm954_vm10, %v951_v19, %v888_v46  ;;  %v894_v34 = vsel %vm862_vm7, %v1740_v45, 128  ;;  %v896_v37 = vsel %vm864_vm8, %v1743_v38, 128 }
 0x367   :  { %vm956_vm11 = vcmp.lt.s32.totalorder %v953_v4, %v890_v47  ;;  %vm958_vm12 = vcmp.lt.s32.totalorder %v955_v20, %v892_v30  ;;  %v930_v23 = vrot.slane %v929_v14, 2  ;;  %vm976_vm5 = vcmask 1040384  }
 0x368   :  { %v957_v21 = vsel %vm956_vm11, %v953_v4, %v890_v47  ;;  %v959_v22 = vsel %vm958_vm12, %v955_v20, %v892_v30  ;;  %vm980_vm6 = vcmp.lt.s32.totalorder %v774_v27, 256 }
 0x369   :  { %vm960_vm13 = vcmp.lt.s32.totalorder %v957_v21, %v894_v34  ;;  %vm962_vm14 = vcmp.lt.s32.totalorder %v959_v22, %v896_v37  ;;  %vm931_vm0 = vcmp.lt.s32.totalorder %v929_v14, %v930_v23 }
 0x36a   :  { %v961_v24 = vsel %vm960_vm13, %v957_v21, %v894_v34  ;;  %v963_v25 = vsel %vm962_vm14, %v959_v22, %v896_v37  ;;  %v932_v28 = vsel %vm931_vm0, %v929_v14, %v930_v23 }
 0x36b   :  { %vm964_vm15 = vcmp.lt.s32.totalorder %v961_v24, %v963_v25  ;;  %v933_v32 = vrot.slane %v932_v28, 1 }
 0x36c   :  { %v965_v26 = vsel %vm964_vm15, %v961_v24, %v963_v25 }
 0x36d   :  { %v966_v53 = vrot.slane %v965_v26, 4  ;;  %vm934_vm3 = vcmp.lt.s32.totalorder %v932_v28, %v933_v32 }
 0x36e   :  { %v935_v48 = vsel %vm934_vm3, %v932_v28, %v933_v32 }
 0x36f   :  { %vm967_vm1 = vcmp.lt.s32.totalorder %v965_v26, %v966_v53 }
 0x370   :  { %v968_v56 = vsel %vm967_vm1, %v965_v26, %v966_v53 }
 0x371   :  { %v969_v29 = vrot.slane %v968_v56, 2 }
 0x373   :  { %vm970_vm2 = vcmp.lt.s32.totalorder %v968_v56, %v969_v29 }
 0x374   :  { %v971_v45 = vsel %vm970_vm2, %v968_v56, %v969_v29 }
 0x375   :  { %v972_v35 = vrot.slane %v971_v45, 1 }
 0x377   :  { %vm973_vm4 = vcmp.lt.s32.totalorder %v971_v45, %v972_v35 }
 0x378   :  { %v974_v38 = vsel %vm973_vm4, %v971_v45, %v972_v35 }
 0x379   :  { %v975_v42 = vrot.slane %v974_v38, 7 }
 0x37b   :  { %v977_v49 = vsel %vm976_vm5, %v935_v48, %v975_v42 }
 0x37c   :  { %982 = vst.msk [vmem:[#allocation2] sm:$0x3] %vm980_vm6, %v977_v49 }
 0x37d   :  { %993 = dma.vmem_to_hbm [thread:$0]  %s989_s14, 32, %s991_s15, [#allocation3]  }
 0x37e   :  { %1250 = dma.done.wait [#allocation3], 32  }
 0x37f   :  { %1251 = vsyncadd [#allocation3], 4294967264 }
 0x380   :  { %1002 = vsyncpa [#allocation3], 1 }

</bundles_post_ra>
